<compile_context>
chip_gen: v5e
topology: v5e:2x2
jax: 0.10.0
libtpu: 0.0.40
codegen_flags: <defaults>
</compile_context>

<pallas_src>
import functools

import jax
import jax.numpy as jnp
from jax.experimental import pallas as pl
from jax.experimental.pallas import tpu as pltpu


def _vector_field_kernel(x_ref, t_ref, w1x_ref, w1t_ref, b1_ref, w2_ref, b2_ref, o_ref):
    """out = relu(x @ W1x + t * W1t + b1) @ W2 + b2."""
    x = x_ref[...]                                                     # (TB, dim)
    t = t_ref[...].astype(jnp.float32)                                 # (TB, 1)

    # Layer 1: MXU dot (f32 accumulation) + VPU broadcast for the t column.
    h = jnp.dot(x, w1x_ref[...], preferred_element_type=jnp.float32)   # (TB, H)
    h = h + t * w1t_ref[...]                                            # (TB,1)*(1,H)
    h = h + b1_ref[...]                                                  # (1, H)
    h = jnp.maximum(h, 0.0)                                              # ReLU, f32 VPU

    # Layer 2: feed the MXU in the weights' dtype (bf16 on v6e/v7x), f32 accum.
    out = jnp.dot(h.astype(w2_ref.dtype), w2_ref[...],
                  preferred_element_type=jnp.float32)                    # (TB, dim)
    out = out + b2_ref[...]                                              # (1, dim)
    o_ref[...] = out.astype(o_ref.dtype)


def init_params(key, dim, hidden=64, dtype=jnp.float32):
    """Torch-layout params: W1 (dim+1, H), b1 (H,), W2 (H, dim), b2 (dim,).

    Mimics nn.Linear's uniform(-1/sqrt(fan_in), +1/sqrt(fan_in)) init
    (weights stored as (in_features, out_features), i.e. torch W.T).
    """
    k1, k2, k3, k4 = jax.random.split(key, 4)
    fan1 = dim + 1
    lim1 = 1.0 / (fan1 ** 0.5)
    w1 = jax.random.uniform(k1, (fan1, hidden), dtype, -lim1, lim1)
    b1 = jax.random.uniform(k2, (hidden,), dtype, -lim1, lim1)
    fan2 = hidden
    lim2 = 1.0 / (fan2 ** 0.5)
    w2 = jax.random.uniform(k3, (hidden, dim), dtype, -lim2, lim2)
    b2 = jax.random.uniform(k4, (dim,), dtype, -lim2, lim2)
    return (w1, b1, w2, b2)


def prepare_params(params, dim, *, hidden_pad=128, compute_dtype=jnp.float32):
    """Split the t-row off W1 and zero-pad the hidden width to 128 (exact math).

    Matmul operands (w1_x, W2) are cast to `compute_dtype` (e.g. bf16 for the
    v6e/v7x MXU); elementwise operands (w1_t, biases) stay f32.
    """
    w1, b1, w2, b2 = params
    hidden = w1.shape[1]

    w1x = jnp.pad(w1[:dim, :], ((0, 0), (0, hidden_pad - hidden)))        # (dim, 128)
    w1t = jnp.pad(w1[dim:dim + 1, :], ((0, 0), (0, hidden_pad - hidden)))  # (1, 128)
    b1p = jnp.pad(b1.reshape(1, hidden), ((0, 0), (0, hidden_pad - hidden)))
    w2p = jnp.pad(w2, ((0, hidden_pad - hidden), (0, 0)))                  # (128, dim)
    b2p = b2.reshape(1, dim)                                               # (1, dim)

    return (w1x.astype(compute_dtype),
            w1t.astype(jnp.float32),
            b1p.astype(jnp.float32),
            w2p.astype(compute_dtype),
            b2p.astype(jnp.float32))


@functools.partial(jax.jit, static_argnames=("tile_b",))
def vector_field_forward(x, t, params, *, tile_b=4096):
    """x: (B, dim), t: (B, 1) -> (B, dim). params from prepare_params()."""
    w1x, w1t, b1, w2, b2 = params
    B, dim = x.shape
    H = w1x.shape[1]            # padded hidden width (128)
    out_dim = w2.shape[1]       # true output width (= dim)
    out_dtype = x.dtype

    # Feed the MXU in the weights' dtype (bf16 on v6e/v7x, f32 otherwise).
    x = x.astype(w1x.dtype)

    # Batch tiling: multiple-of-8 rows, large tiles (amortize per-step
    # overhead), pad + slice only if the batch is ragged.
    tile_b = max(8, (tile_b // 8) * 8)
    b8 = ((B + 7) // 8) * 8
    tb = min(tile_b, b8)
    bp = ((b8 + tb - 1) // tb) * tb
    if bp != B:
        x = jnp.pad(x, ((0, bp - B), (0, 0)))
        t = jnp.pad(t, ((0, bp - B), (0, 0)))

    grid = (bp // tb,)
    isz = jnp.dtype(x.dtype).itemsize
    cost = pl.CostEstimate(
        flops=2 * bp * (dim * H + H * out_dim),
        transcendentals=0,
        bytes_accessed=int(bp * (dim + 1) * isz                          # x, t in
                           + bp * out_dim * jnp.dtype(out_dtype).itemsize  # out
                           + (w1x.size + w2.size) * isz
                           + (w1t.size + b1.size + b2.size) * 4),
    )

    out = pl.pallas_call(
        _vector_field_kernel,
        out_shape=jax.ShapeDtypeStruct((bp, out_dim), out_dtype),
        grid_spec=pltpu.PrefetchScalarGridSpec(
            num_scalar_prefetch=0,
            grid=grid,
            in_specs=[
                pl.BlockSpec((tb, dim), lambda i: (i, 0)),       # x tile
                pl.BlockSpec((tb, 1), lambda i: (i, 0)),         # t tile
                pl.BlockSpec((dim, H), lambda i: (0, 0)),        # w1_x (resident)
                pl.BlockSpec((1, H), lambda i: (0, 0)),          # w1_t (resident)
                pl.BlockSpec((1, H), lambda i: (0, 0)),          # b1   (resident)
                pl.BlockSpec((H, out_dim), lambda i: (0, 0)),    # w2   (resident)
                pl.BlockSpec((1, out_dim), lambda i: (0, 0)),    # b2   (resident)
            ],
            out_specs=pl.BlockSpec((tb, out_dim), lambda i: (i, 0)),
        ),
        compiler_params=pltpu.CompilerParams(
            dimension_semantics=("parallel",),       # megacore sharding on v7x
            vmem_limit_bytes=32 * 1024 * 1024,       # safe on v5e/v6e/v7x
        ),
        cost_estimate=cost,
    )(x, t, w1x, w1t, b1, w2, b2)

    if bp != B:
        out = out[:B]
    return out


if __name__ == "__main__":
    key = jax.random.PRNGKey(0)
    kx, kt, kp = jax.random.split(key, 3)

    dim = 4
    batch = 8

    x = jax.random.normal(kx, (batch, dim), jnp.float32)
    t = jax.random.uniform(kt, (batch, 1), jnp.float32)
    raw_params = init_params(kp, dim)

    # Pure-JAX reference of the original module's math.
    w1, b1, w2, b2 = raw_params
    xt = jnp.concatenate([x, t], axis=1)
    ref = jnp.maximum(xt @ w1 + b1, 0.0) @ w2 + b2

    # f32 path (exact): split-t + hidden-padded kernel must match the reference.
    params_f32 = prepare_params(raw_params, dim, compute_dtype=jnp.float32)
    out = jax.block_until_ready(vector_field_forward(x, t, params_f32))
    assert out.shape == (batch, dim)
    assert jnp.allclose(out, ref, atol=1e-5, rtol=1e-5)

    # bf16 MXU-input path (v6e/v7x): f32 accumulation, loose tolerance.
    params_bf16 = prepare_params(raw_params, dim, compute_dtype=jnp.bfloat16)
    out_bf = jax.block_until_ready(
        vector_field_forward(x.astype(jnp.bfloat16), t, params_bf16))
    assert out_bf.shape == (batch, dim)
    assert jnp.allclose(out_bf.astype(jnp.float32), ref, atol=5e-2, rtol=5e-2)

    print("KERNEL_OK")
</pallas_src>

<mosaic_0001>
module attributes {stable_mosaic.version = 11 : i64} {
  func.func @_vector_field_kernel(%arg0: i32, %arg1: memref<8x4xf32, #tpu.memory_space<vmem>>, %arg2: memref<8x1xf32, #tpu.memory_space<vmem>>, %arg3: memref<4x128xf32, #tpu.memory_space<vmem>>, %arg4: memref<1x128xf32, #tpu.memory_space<vmem>>, %arg5: memref<1x128xf32, #tpu.memory_space<vmem>>, %arg6: memref<128x4xf32, #tpu.memory_space<vmem>>, %arg7: memref<1x4xf32, #tpu.memory_space<vmem>>, %arg8: memref<8x4xf32, #tpu.memory_space<vmem>>) attributes {dimension_semantics = [#tpu.dimension_semantics<parallel>], iteration_bounds = array<i64: 1>, scalar_prefetch = 0 : i64, scratch_operands = 0 : i64, tpu.core_type = #tpu.core_type<tc>, window_params = [{transform_indices = @transform_0, window_bounds = array<i64: 8, 4>}, {transform_indices = @transform_1, window_bounds = array<i64: 8, 1>}, {pipeline_mode = #tpu.pipeline_mode<synchronous>, transform_indices = @transform_2, window_bounds = array<i64: 4, 128>}, {pipeline_mode = #tpu.pipeline_mode<synchronous>, transform_indices = @transform_3, window_bounds = array<i64: 1, 128>}, {pipeline_mode = #tpu.pipeline_mode<synchronous>, transform_indices = @transform_4, window_bounds = array<i64: 1, 128>}, {pipeline_mode = #tpu.pipeline_mode<synchronous>, transform_indices = @transform_5, window_bounds = array<i64: 128, 4>}, {pipeline_mode = #tpu.pipeline_mode<synchronous>, transform_indices = @transform_6, window_bounds = array<i64: 1, 4>}, {transform_indices = @transform_7, window_bounds = array<i64: 8, 4>}]} {
    %c0 = arith.constant 0 : index
    %c0_0 = arith.constant 0 : index
    %0 = vector.load %arg1[%c0, %c0_0] : memref<8x4xf32, #tpu.memory_space<vmem>>, vector<8x4xf32>
    %c0_1 = arith.constant 0 : index
    %c0_2 = arith.constant 0 : index
    %1 = vector.load %arg2[%c0_1, %c0_2] : memref<8x1xf32, #tpu.memory_space<vmem>>, vector<8x1xf32>
    %c0_3 = arith.constant 0 : index
    %c0_4 = arith.constant 0 : index
    %2 = vector.load %arg3[%c0_3, %c0_4] : memref<4x128xf32, #tpu.memory_space<vmem>>, vector<4x128xf32>
    %cst = arith.constant dense<0.000000e+00> : vector<8x128xf32>
    %3 = tpu.matmul %0, %2, %cst {dimension_numbers = #tpu.dot_dimension_numbers<[1], [0], [0], [1], [0, 0, 1, 1], [], []>} : vector<8x4xf32>, vector<4x128xf32>, vector<8x128xf32> -> vector<8x128xf32>
    %c0_5 = arith.constant 0 : index
    %c0_6 = arith.constant 0 : index
    %4 = vector.load %arg4[%c0_5, %c0_6] : memref<1x128xf32, #tpu.memory_space<vmem>>, vector<1x128xf32>
    %5 = vector.broadcast %1 : vector<8x1xf32> to vector<8x128xf32>
    %6 = vector.broadcast %4 : vector<1x128xf32> to vector<8x128xf32>
    %7 = arith.mulf %5, %6 : vector<8x128xf32>
    %8 = arith.addf %3, %7 : vector<8x128xf32>
    %c0_7 = arith.constant 0 : index
    %c0_8 = arith.constant 0 : index
    %9 = vector.load %arg5[%c0_7, %c0_8] : memref<1x128xf32, #tpu.memory_space<vmem>>, vector<1x128xf32>
    %10 = vector.broadcast %9 : vector<1x128xf32> to vector<8x128xf32>
    %11 = arith.addf %8, %10 : vector<8x128xf32>
    %cst_9 = arith.constant 0.000000e+00 : f32
    %12 = vector.broadcast %cst_9 : f32 to vector<8x128xf32>
    %13 = arith.maximumf %11, %12 : vector<8x128xf32>
    %c0_10 = arith.constant 0 : index
    %c0_11 = arith.constant 0 : index
    %14 = vector.load %arg6[%c0_10, %c0_11] : memref<128x4xf32, #tpu.memory_space<vmem>>, vector<128x4xf32>
    %cst_12 = arith.constant dense<0.000000e+00> : vector<8x4xf32>
    %15 = tpu.matmul %13, %14, %cst_12 {dimension_numbers = #tpu.dot_dimension_numbers<[1], [0], [0], [1], [0, 0, 1, 1], [], []>} : vector<8x128xf32>, vector<128x4xf32>, vector<8x4xf32> -> vector<8x4xf32>
    %c0_13 = arith.constant 0 : index
    %c0_14 = arith.constant 0 : index
    %16 = vector.load %arg7[%c0_13, %c0_14] : memref<1x4xf32, #tpu.memory_space<vmem>>, vector<1x4xf32>
    %17 = vector.broadcast %16 : vector<1x4xf32> to vector<8x4xf32>
    %18 = arith.addf %15, %17 : vector<8x4xf32>
    %c0_15 = arith.constant 0 : index
    %c0_16 = arith.constant 0 : index
    %19 = vector.load %arg8[%c0_15, %c0_16] : memref<8x4xf32, #tpu.memory_space<vmem>>, vector<8x4xf32>
    tpu.vector_store %arg8[%c0_15, %c0_16], %18 {strides = array<i32>} : memref<8x4xf32, #tpu.memory_space<vmem>>, vector<8x4xf32>,
    return
  }
  func.func @transform_0(%arg0: i32) -> (i32, i32) {
    %c0_i32 = arith.constant 0 : i32
    %c0_i32_0 = arith.constant 0 : i32
    return %arg0, %c0_i32 : i32, i32
  }
  func.func @transform_1(%arg0: i32) -> (i32, i32) {
    %c0_i32 = arith.constant 0 : i32
    %c0_i32_0 = arith.constant 0 : i32
    return %arg0, %c0_i32 : i32, i32
  }
  func.func @transform_2(%arg0: i32) -> (i32, i32) {
    %c0_i32 = arith.constant 0 : i32
    %c0_i32_0 = arith.constant 0 : i32
    %c0_i32_1 = arith.constant 0 : i32
    return %c0_i32, %c0_i32_0 : i32, i32
  }
  func.func @transform_3(%arg0: i32) -> (i32, i32) {
    %c0_i32 = arith.constant 0 : i32
    %c0_i32_0 = arith.constant 0 : i32
    %c0_i32_1 = arith.constant 0 : i32
    return %c0_i32, %c0_i32_0 : i32, i32
  }
  func.func @transform_4(%arg0: i32) -> (i32, i32) {
    %c0_i32 = arith.constant 0 : i32
    %c0_i32_0 = arith.constant 0 : i32
    %c0_i32_1 = arith.constant 0 : i32
    return %c0_i32, %c0_i32_0 : i32, i32
  }
  func.func @transform_5(%arg0: i32) -> (i32, i32) {
    %c0_i32 = arith.constant 0 : i32
    %c0_i32_0 = arith.constant 0 : i32
    %c0_i32_1 = arith.constant 0 : i32
    return %c0_i32, %c0_i32_0 : i32, i32
  }
  func.func @transform_6(%arg0: i32) -> (i32, i32) {
    %c0_i32 = arith.constant 0 : i32
    %c0_i32_0 = arith.constant 0 : i32
    %c0_i32_1 = arith.constant 0 : i32
    return %c0_i32, %c0_i32_0 : i32, i32
  }
  func.func @transform_7(%arg0: i32) -> (i32, i32) {
    %c0_i32 = arith.constant 0 : i32
    %c0_i32_0 = arith.constant 0 : i32
    return %arg0, %c0_i32 : i32, i32
  }
}

</mosaic_0001>

<bundles_post_ra>
// kernel: vector_field_forward.1
= control target key start
LH: loop header
LB: loop body
LE: loop exit
PB: predicated region body
PF: predicated region fallthrough
CT: control target
= control target key end

     0   :  { %vm43_vm0 = vcmask 1043456   ;;  %vm39_vm1 = vcmask 31744   ;;  %v125_v2 = vmov 0   ;;  %s237_s2 = inlined_call_operand.vmem [shape: f32[4,128], index: 2, kind: input, shape index: {}]   ;;  %s238_s0 = inlined_call_operand.vmem [shape: f32[8,4], index: 0, kind: input, shape index: {}]   ;;  %s239_s1 = inlined_call_operand.vmem [shape: f32[8,1], index: 1, kind: input, shape index: {}]   ;;  %s240_s5 = inlined_call_operand.vmem [shape: f32[128,4], index: 5, kind: input, shape index: {}]   ;;  %s241_s3 = inlined_call_operand.vmem [shape: f32[1,128], index: 3, kind: input, shape index: {}]   ;;  %s242_s4 = inlined_call_operand.vmem [shape: f32[1,128], index: 4, kind: input, shape index: {}]   ;;  %s243_s6 = inlined_call_operand.vmem [shape: f32[1,4], index: 6, kind: input, shape index: {}]   ;;  %s244_s7 = inlined_call_operand.vmem [shape: f32[8,4], index: 7, kind: output, shape index: {}]  }
   0x1   :  { %v28_v0 = vld [vmem:[%s237_s2] sm:$0xf]  ;;  %121 = vset.pattern.permute.xlu0 %v125_v2  ;;  %v88_v4 = vld [vmem:[%s240_s5 + $0x78] sm:$0xff]  ;;  %v87_v5 = vld [vmem:[%s240_s5 + $0x70] sm:$0xff] }
   0x2   :  { %v26_v1 = vld [vmem:[%s238_s0] sm:$0xff]  ;;  %118 = vmatpush.msk.msra.mxu0 %vm43_vm0, %v28_v0  ;;  %93 = vmatpush.msra.mxu1 %v88_v4  ;;  %v86_v6 = vld [vmem:[%s240_s5 + $0x68] sm:$0xff]  ;;  %v84_v8 = vld [vmem:[%s240_s5 + $0x58] sm:$0xff] }
   0x3   :  { %v27_v3 = vld [vmem:[%s239_s1] sm:$0xff]  ;;  %119 = vmatmul.msk.f32.vlgmr.msra.gmra.mxu0 %vm39_vm1, %v26_v1  ;;  %v83_v9 = vld [vmem:[%s240_s5 + $0x50] sm:$0xff]  ;;  %v82_v10 = vld [vmem:[%s240_s5 + $0x48] sm:$0xff] }
   0x4   :  { %32 = vperm.xlu0 %121, %v27_v3   ;;  %94 = vmatpush.msra.mxu1 %v87_v5  ;;  %v85_v7 = vld [vmem:[%s240_s5 + $0x60] sm:$0xff]  ;;  %v80_v12 = vld [vmem:[%s240_s5 + $0x38] sm:$0xff]  ;;  %v79_v13 = vld [vmem:[%s240_s5 + $0x30] sm:$0xff] }
   0x5   :  { %v81_v11 = vld [vmem:[%s240_s5 + $0x40] sm:$0xff]  ;;  %v78_v14 = vld [vmem:[%s240_s5 + $0x28] sm:$0xff]  ;;  %v76_v16 = vld [vmem:[%s240_s5 + $0x18] sm:$0xff] }
   0x6   :  { %95 = vmatpush.msra.mxu1 %v86_v6  ;;  %v77_v15 = vld [vmem:[%s240_s5 + $0x20] sm:$0xff]  ;;  %v75_v17 = vld [vmem:[%s240_s5 + $0x10] sm:$0xff]  ;;  %v74_v18 = vld [vmem:[%s240_s5 + $0x8] sm:$0xff] }
   0x7   :  { %v73_v19 = vld [vmem:[%s240_s5] sm:$0xff] }
   0x8   :  { %96 = vmatpush.msra.mxu1 %v85_v7  ;;  %v122_v20 = vld [vmem:[%s241_s3] ss:$0 sm:$0xff] }
   0x9   :  { %v123_v23 = vld [vmem:[%s242_s4] ss:$0 sm:$0xff] }
   0xa   :  { %97 = vmatpush.msra.mxu1 %v84_v8  ;;  %v124_v28 = vld [vmem:[%s243_s6] ss:$0 sm:$0xff] }
   0xc   :  { %98 = vmatpush.msra.mxu1 %v83_v9 }
   0xe   :  { %99 = vmatpush.msra.mxu1 %v82_v10 }
  0x10   :  { %100 = vmatpush.msra.mxu1 %v81_v11 }
  0x12   :  { %101 = vmatpush.msra.mxu1 %v80_v12 }
  0x14   :  { %102 = vmatpush.msra.mxu1 %v79_v13 }
  0x16   :  { %103 = vmatpush.msra.mxu1 %v78_v14 }
  0x18   :  { %104 = vmatpush.msra.mxu1 %v77_v15 }
  0x1a   :  { %105 = vmatpush.msra.mxu1 %v76_v16 }
  0x1c   :  { %106 = vmatpush.msra.mxu1 %v75_v17 }
  0x1e   :  { %107 = vmatpush.msra.mxu1 %v74_v18 }
  0x20   :  { %108 = vmatpush.msra.mxu1 %v73_v19 }
  0x76   :  { %v33_v21 = vpop.permute.xlu0 %32 }
  0x77   :  { %v38_v22 = vmul.f32 %v122_v20, %v33_v21 }
  0x80   :  { %v64_v24 = vpop.f32.mrf.mxu0 }
  0x81   :  { %v65_v25 = vadd.f32 %v64_v24, %v38_v22 }
  0x83   :  { %v71_v26 = vadd.f32 %v123_v23, %v65_v25 }
  0x85   :  { %v72_v27 = vmax.f32 %v71_v26, 0.0 }
  0x87   :  { %109 = vmatmul.f32.vlgmr.msra.gmra.mxu1 %v72_v27 }
 0x104   :  { %v110_v29 = vpop.f32.mrf.mxu1 }
 0x105   :  { %v111_v30 = vadd.f32 %v124_v28, %v110_v29 }
 0x107   :  { %113 = vst.msk [vmem:[%s244_s7] sm:$0xff] %vm39_vm1, %v111_v30 }

</bundles_post_ra>
